<compile_context>
chip_gen: v5e
topology: v5e:2x2
jax: 0.10.0
libtpu: 0.0.40
codegen_flags: <defaults>
</compile_context>

<pallas_src>
import functools

import jax
import jax.numpy as jnp
from jax import lax
from jax.experimental import pallas as pl
from jax.experimental.pallas import tpu as pltpu


def _round_up(a: int, b: int) -> int:
    return ((a + b - 1) // b) * b


def _gem_kernel(x_ref, o_ref, acc_ref, *, p: float, eps: float,
                hw: int, tile_hw: int, mask_cols: bool):
    # x_ref: (TILE_R, TILE_HW) tile in VMEM; o_ref: (TILE_R, 1);
    # acc_ref: (TILE_R, 1) f32 running sum over the hw axis.
    j = pl.program_id(1)

    @pl.when(j == 0)
    def _():
        acc_ref[...] = jnp.zeros_like(acc_ref)

    x = x_ref[...].astype(jnp.float32)
    # clamp(min=eps)  (VPU)
    x = jnp.maximum(x, eps)

    if float(p).is_integer() and p > 0:
        # Integer power -> a couple of VPU multiplies (free under the DMA),
        # instead of exp(p*log(x)) = 2 EUP transcendentals per element.
        xp = lax.integer_pow(x, int(p))
    else:
        # TODO(synk): non-integer p flips the kernel EUP-bound (exp+log/elem).
        xp = x ** p

    if mask_cols:
        # Ragged last hw tile: zero out-of-range lanes so they don't pollute
        # the cross-column sum of real rows.
        col = j * tile_hw + lax.broadcasted_iota(jnp.int32, xp.shape, 1)
        xp = jnp.where(col < hw, xp, 0.0)

    acc_ref[...] += jnp.sum(xp, axis=-1, keepdims=True)  # XLU reduce

    @pl.when(j == pl.num_programs(1) - 1)
    def _():
        # avg_pool2d over the full spatial extent == mean over H*W.
        m = acc_ref[...] * (1.0 / hw)
        # Epilogue acts on (TILE_R, 1) data only -> pow/sqrt cost negligible.
        if p == 1.0:
            r = m
        elif p == 2.0:
            r = jnp.sqrt(m)
        else:
            r = m ** (1.0 / p)
        o_ref[...] = r.astype(o_ref.dtype)


def gem(x: jax.Array, p: float = 3.0, eps: float = 1e-6) -> jax.Array:
    """Generalized Mean Pooling.  x: (B, C, H, W) -> (B, C, 1, 1)."""
    B, C, H, W = x.shape
    rows = B * C
    hw = H * W
    x2d = x.reshape(rows, hw)

    # --- per-generation VMEM budget (v7x: 64 MiB / TC, v5e/v6e: 128 MiB) ---
    try:
        vmem_cap = int(pltpu.get_tpu_info().vmem_capacity_bytes)
    except Exception:
        vmem_cap = 64 * 1024 * 1024  # conservative (v7x)
    budget = vmem_cap // 2           # spent on 2x input buffers + f32 temps
    vmem_limit = (vmem_cap * 3) // 4  # scoped limit with headroom

    itemsize = jnp.dtype(x.dtype).itemsize
    # Per lane-padded element: double-buffered input + ~2 f32 temporaries
    # (astype/clamp result + pow result) live at peak.
    bytes_per_lane = 2 * itemsize + 2 * 4

    # --- decide whether the hw axis needs tiling (very large spatial only) ---
    hw_pad_full = _round_up(hw, 128)
    if 8 * hw_pad_full * bytes_per_lane <= budget:
        tile_hw = hw                      # full dim -> (8,128) rule satisfied
        num_hw_tiles = 1
    else:
        tile_hw = max(128, ((budget // (8 * bytes_per_lane)) // 128) * 128)
        num_hw_tiles = pl.cdiv(hw, tile_hw)
    mask_cols = (num_hw_tiles > 1) and (hw % tile_hw != 0)

    # --- row tile sizing with lane-padded accounting ---
    hw_pad = _round_up(tile_hw, 128)
    bytes_per_row = hw_pad * bytes_per_lane
    tile_r = max(1, budget // bytes_per_row)
    tile_r = min(tile_r, rows)
    if rows >= 32:
        # Keep >= ~4 row tiles so the pipeline overlaps DMA/compute and both
        # v7x TensorCores get work; costs nothing on v5e/v6e.
        tile_r = min(tile_r, _round_up(pl.cdiv(rows, 4), 8))
    if rows >= 8:
        tile_r = max(8, (tile_r // 8) * 8)   # sublane multiple
    else:
        tile_r = rows                        # full dim -> constraint satisfied
    num_row_tiles = pl.cdiv(rows, tile_r)
    # No jnp.pad: a ragged last row tile reads OOB garbage, but rows are fully
    # independent and the corresponding output writes are masked by Pallas.

    kernel = functools.partial(
        _gem_kernel, p=float(p), eps=float(eps),
        hw=hw, tile_hw=tile_hw, mask_cols=mask_cols)

    out2d = pl.pallas_call(
        kernel,
        out_shape=jax.ShapeDtypeStruct((rows, 1), x.dtype),
        grid_spec=pltpu.PrefetchScalarGridSpec(
            num_scalar_prefetch=0,
            grid=(num_row_tiles, num_hw_tiles),
            in_specs=[pl.BlockSpec((tile_r, tile_hw), lambda i, j: (i, j))],
            out_specs=pl.BlockSpec((tile_r, 1), lambda i, j: (i, 0)),
            scratch_shapes=[pltpu.VMEM((tile_r, 1), jnp.float32)],
        ),
        compiler_params=pltpu.CompilerParams(
            # Row tiles independent -> shard across TCs; hw axis is a reduction.
            dimension_semantics=("parallel", "arbitrary"),
            vmem_limit_bytes=int(vmem_limit),
        ),
    )(x2d)

    return out2d.reshape(B, C, 1, 1)


if __name__ == "__main__":
    key = jax.random.PRNGKey(0)
    k0, k1 = jax.random.split(key)

    # Small shape consistent with the module's BxCxHxW expectation.
    x = jax.random.normal(k0, (2, 4, 16, 16), dtype=jnp.float32)
    out = jax.block_until_ready(gem(x, p=3, eps=1e-6))
    ref = jnp.mean(jnp.maximum(x, 1e-6) ** 3.0, axis=(2, 3), keepdims=True) ** (1.0 / 3.0)
    assert out.shape == (2, 4, 1, 1)
    assert jnp.allclose(out, ref, atol=1e-5, rtol=1e-4), float(jnp.max(jnp.abs(out - ref)))

    # Ragged-rows path: rows = 15 (not a multiple of the 8-row tile), hw = 49.
    x2 = jax.random.normal(k1, (3, 5, 7, 7), dtype=jnp.float32)
    out2 = jax.block_until_ready(gem(x2, p=3, eps=1e-6))
    ref2 = jnp.mean(jnp.maximum(x2, 1e-6) ** 3.0, axis=(2, 3), keepdims=True) ** (1.0 / 3.0)
    assert out2.shape == (3, 5, 1, 1)
    assert jnp.allclose(out2, ref2, atol=1e-5, rtol=1e-4), float(jnp.max(jnp.abs(out2 - ref2)))

    print("KERNEL_OK")
</pallas_src>

<mosaic_0001>
module attributes {stable_mosaic.version = 11 : i64} {
  func.func @_gem_kernel(%arg0: i32, %arg1: i32, %arg2: memref<8x256xf32, #tpu.memory_space<vmem>>, %arg3: memref<8x1xf32, #tpu.memory_space<vmem>>, %arg4: memref<8x1xf32, #tpu.memory_space<vmem>>) attributes {dimension_semantics = [#tpu.dimension_semantics<parallel>, #tpu.dimension_semantics<arbitrary>], iteration_bounds = array<i64: 1, 1>, scalar_prefetch = 0 : i64, scratch_operands = 1 : i64, tpu.core_type = #tpu.core_type<tc>, window_params = [{transform_indices = @transform_0, window_bounds = array<i64: 8, 256>}, {transform_indices = @transform_1, window_bounds = array<i64: 8, 1>}]} {
    %c0_i32 = arith.constant 0 : i32
    %0 = arith.cmpi eq, %arg1, %c0_i32 : i32
    %1 = arith.extui %0 : i1 to i32
    %c0_i32_0 = arith.constant 0 : i32
    %2 = arith.cmpi ne, %1, %c0_i32_0 : i32
    scf.if %2 {
      %cst_9 = arith.constant 0.000000e+00 : f32
      %16 = vector.broadcast %cst_9 : f32 to vector<8x1xf32>
      %c0_10 = arith.constant 0 : index
      %c0_11 = arith.constant 0 : index
      %17 = vector.load %arg4[%c0_10, %c0_11] : memref<8x1xf32, #tpu.memory_space<vmem>>, vector<8x1xf32>
      tpu.vector_store %arg4[%c0_10, %c0_11], %16 {strides = array<i32>} : memref<8x1xf32, #tpu.memory_space<vmem>>, vector<8x1xf32>,
    } else {
    }
    %c0 = arith.constant 0 : index
    %c0_1 = arith.constant 0 : index
    %3 = vector.load %arg2[%c0, %c0_1] : memref<8x256xf32, #tpu.memory_space<vmem>>, vector<8x256xf32>
    %cst = arith.constant 9.99999997E-7 : f32
    %4 = vector.broadcast %cst : f32 to vector<8x256xf32>
    %5 = arith.maximumf %3, %4 : vector<8x256xf32>
    %6 = arith.mulf %5, %5 : vector<8x256xf32>
    %7 = arith.mulf %5, %6 : vector<8x256xf32>
    %c0_2 = arith.constant 0 : index
    %c0_3 = arith.constant 0 : index
    %8 = vector.load %arg4[%c0_2, %c0_3] : memref<8x1xf32, #tpu.memory_space<vmem>>, vector<8x1xf32>
    %cst_4 = arith.constant dense<0.000000e+00> : vector<8xf32>
    %9 = vector.multi_reduction <add>, %7, %cst_4 [1] : vector<8x256xf32> to vector<8xf32>
    %10 = vector.shape_cast %9 : vector<8xf32> to vector<8x1xf32>
    %11 = arith.addf %8, %10 : vector<8x1xf32>
    %c0_5 = arith.constant 0 : index
    %c0_6 = arith.constant 0 : index
    %12 = vector.load %arg4[%c0_5, %c0_6] : memref<8x1xf32, #tpu.memory_space<vmem>>, vector<8x1xf32>
    tpu.vector_store %arg4[%c0_5, %c0_6], %11 {strides = array<i32>} : memref<8x1xf32, #tpu.memory_space<vmem>>, vector<8x1xf32>,
    %c0_i32_7 = arith.constant 0 : i32
    %13 = arith.cmpi eq, %arg1, %c0_i32_7 : i32
    %14 = arith.extui %13 : i1 to i32
    %c0_i32_8 = arith.constant 0 : i32
    %15 = arith.cmpi ne, %14, %c0_i32_8 : i32
    scf.if %15 {
      %c0_9 = arith.constant 0 : index
      %c0_10 = arith.constant 0 : index
      %16 = vector.load %arg4[%c0_9, %c0_10] : memref<8x1xf32, #tpu.memory_space<vmem>>, vector<8x1xf32>
      %cst_11 = arith.constant 3.906250e-03 : f32
      %17 = vector.broadcast %cst_11 : f32 to vector<8x1xf32>
      %18 = arith.mulf %16, %17 : vector<8x1xf32>
      %cst_12 = arith.constant 0.333333343 : f32
      %19 = vector.broadcast %cst_12 : f32 to vector<8x1xf32>
      %20 = math.powf %18, %19 : vector<8x1xf32>
      %c0_13 = arith.constant 0 : index
      %c0_14 = arith.constant 0 : index
      %21 = vector.load %arg3[%c0_13, %c0_14] : memref<8x1xf32, #tpu.memory_space<vmem>>, vector<8x1xf32>
      tpu.vector_store %arg3[%c0_13, %c0_14], %20 {strides = array<i32>} : memref<8x1xf32, #tpu.memory_space<vmem>>, vector<8x1xf32>,
    } else {
    }
    return
  }
  func.func @transform_0(%arg0: i32, %arg1: i32) -> (i32, i32) {
    %c0_i32 = arith.constant 0 : i32
    return %arg0, %arg1 : i32, i32
  }
  func.func @transform_1(%arg0: i32, %arg1: i32) -> (i32, i32) {
    %c0_i32 = arith.constant 0 : i32
    %c0_i32_0 = arith.constant 0 : i32
    return %arg0, %c0_i32 : i32, i32
  }
}

</mosaic_0001>

<bundles_post_ra>
// kernel: tpu_custom_call.1
= control target key start
LH: loop header
LB: loop body
LE: loop exit
PB: predicated region body
PF: predicated region fallthrough
CT: control target
= control target key end

     0   :  { %6 = vsyncpa [#allocation4], 0  ;;  %s111_s9 = smov [#allocation3]   ;;  %s132_s0 = inlined_call_operand.hbm [shape: f32[8,256], index: 0, kind: input, shape index: {}]   ;;  %s133_s1 = inlined_call_operand.vmem [shape: f32[8,1], index: 1, kind: output, shape index: {}]  }
   0x1   :  { %s12_s8 = sshll.u32 %s132_s0, 4  ;;  %s14_s10 = sshll.u32 %s111_s9, 4  ;;  %s13_s8 = int_to_ptr.hbm [resolvable:$true] %s12_s8  ;;  %s15_s10 = int_to_ptr.vmem [resolvable:$true] %s14_s10 }
   0x2   :  { %17 = dma.hbm_to_vmem [thread:$0]  %s13_s8, 256, %s15_s10, [#allocation4]  }
   0x3   :  { %109 = dma.done.wait [#allocation4], 256  }
   0x4   :  { %110 = vsyncadd [#allocation4], 4294967040  ;;  %vm26_vm0 = vcmask 7168   ;;  %v112_v0 = vmov 0.0   ;;  %v28_v1 = vld [vmem:[#allocation3] sm:$0xff]  ;;  %v29_v2 = vld [vmem:[#allocation3 + $0x8] sm:$0xff] }
   0x5   :  { %27 = vst.msk [vmem:[#allocation2] sm:$0xff] %vm26_vm0, %v112_v0  ;;  %v30_v3 = vmax.f32 %v28_v1, 1e-06  ;;  %v31_v4 = vmax.f32 %v29_v2, 1e-06 }
   0x7   :  { %v32_v5 = vmul.f32 %v30_v3, %v30_v3  ;;  %v33_v6 = vmul.f32 %v31_v4, %v31_v4 }
   0x9   :  { %v34_v7 = vmul.f32 %v32_v5, %v30_v3  ;;  %v35_v8 = vmul.f32 %v33_v6, %v31_v4 }
   0xb   :  { %v37_v9 = vadd.f32 %v35_v8, %v34_v7 }
   0xc   :  { %v36_v10 = vld [vmem:[#allocation2] sm:$0xff] }
   0xd   :  { %38 = vadd.xlane.f32.xlu0 %v37_v9 }
  0x80   :  { %v39_v11 = vpop.xlane.xlu0 %38 }
  0x81   :  { %v40_v12 = vadd.f32 %v39_v11, %v36_v10 }
  0x83   :  { %42 = vst.msk [vmem:[#allocation2] sm:$0xff] %vm26_vm0, %v40_v12 }
  0x8a   :  { %v46_v13 = vld [vmem:[#allocation2] sm:$0xff] }
  0x8b   :  { %v47_v14 = vmul.f32 0.00390625, %v46_v13 }
  0x8d   :  { %v57_v15 = vand.u32 2147483647, %v47_v14  ;;  %v74_v27 = vand.u32 2147483648, %v47_v14  ;;  %vm56_vm3 = vcmp.lt.f32.partialorder %v47_v14, 0.0  ;;  %vm55_vm4 = vcmp.eq.f32.partialorder %v47_v14, 0.0 }
  0x8f   :  { %81 = vlog2.f32 %v57_v15  ;;  %vm71_vm1 = vweird.f32 %v57_v15  ;;  %vm73_vm2 = vcmp.eq.f32.partialorder %v57_v15, 0.0  ;;  %vm58_vm5 = vcmp.eq.f32.partialorder %v57_v15, inf }
  0x95   :  { %v82_v16 = vpop.eup %81 }
  0x96   :  { %v61_v17 = vmul.f32 -0.33333334, %v82_v16 }
  0x98   :  { %83 = vpow2.f32 %v61_v17 }
  0x9e   :  { %v84_v18 = vpop.eup %83 }
  0x9f   :  { %v63_v19 = vmul.f32 %v84_v18, %v84_v18 }
  0xa1   :  { %v64_v20 = vmul.f32 %v63_v19, %v57_v15 }
  0xa3   :  { %v65_v21 = vmul.f32 %v64_v20, %v63_v19 }
  0xa5   :  { %v66_v22 = vsub.f32 %v65_v21, %v84_v18 }
  0xa7   :  { %v67_v23 = vmul.f32 -0.33333334, %v66_v22 }
  0xa9   :  { %v68_v24 = vadd.f32 %v84_v18, %v67_v23 }
  0xab   :  { %v69_v25 = vmul.f32 %v68_v24, %v47_v14 }
  0xad   :  { %v70_v26 = vmul.f32 %v69_v25, %v68_v24 }
  0xaf   :  { %v72_v28 = vsel %vm71_vm1, %v47_v14, %v70_v26 }
  0xb0   :  { %v75_v29 = vsel %vm73_vm2, %v74_v27, %v72_v28 }
  0xb1   :  { %v76_v30 = vsel %vm56_vm3, nan, %v75_v29 }
  0xb2   :  { %v77_v31 = vsel %vm55_vm4, 0.0, %v76_v30 }
  0xb3   :  { %v78_v32 = vsel %vm58_vm5, inf, %v77_v31 }
  0xb4   :  { %49 = vst.msk [vmem:[%s133_s1] sm:$0xff] %vm26_vm0, %v78_v32 }
  0xb5   :  { %54 = vsyncpa [#allocation4], 1 }

</bundles_post_ra>
